<compile_context>
chip_gen: v7x
topology: tpu7x:2x2x1
jax: 0.10.0
libtpu: 0.0.40
codegen_flags: <defaults>
</compile_context>

<pallas_src>
import jax
import jax.numpy as jnp
from jax.experimental import pallas as pl
from jax.experimental.pallas import tpu as pltpu


def _make_mbstd_kernel(G, C, HW, F, c):
    CHW = C * HW
    FHW = F * HW
    OHW = (C + F) * HW
    inv_g = 1.0 / G
    inv_chw = 1.0 / (c * HW)
    in_aligned = (CHW % 128) == 0
    out_aligned = (OHW % 128) == 0

    def kernel(x_hbm, o_hbm, buf, sem_in, sem_out):
        # x_hbm: (G, M*C*HW) HBM ; o_hbm: (G, M*(C+F)*HW) HBM
        # buf:   (G, (C+F)*HW) VMEM staging buffer for one group column
        m = pl.program_id(0)
        in_start = m * CHW
        out_start = m * OHW
        if in_aligned:
            in_start = pl.multiple_of(in_start, 128)
        if out_aligned:
            out_start = pl.multiple_of(out_start, 128)

        # Passthrough: DMA this group column straight into the staging buffer
        # (no separate double-buffered input block, no VMEM copy stream).
        cp_in = pltpu.make_async_copy(
            x_hbm.at[:, pl.ds(in_start, CHW)],
            buf.at[:, pl.ds(0, CHW)],
            sem_in,
        )
        cp_in.start()
        cp_in.wait()

        # Two-pass group statistics in f32 on the (G, C*HW) slab
        # (G on sublanes, C*HW on lanes -> dense, full-width VPU work).
        y = buf[:, pl.ds(0, CHW)].astype(jnp.float32)          # (G, C*HW)
        mu = jnp.sum(y, axis=0, keepdims=True) * inv_g          # (1, C*HW)
        d = y - mu
        var = jnp.sum(d * d, axis=0, keepdims=True) * inv_g     # (1, C*HW)
        sd = jnp.sqrt(var + 1e-8)                                # (1, C*HW)

        # Mean over (c, H, W): lane reduce on the tiny (F, c*HW) sd slab.
        stat = jnp.sum(sd.reshape(F, c * HW), axis=-1, keepdims=True)  # (F, 1)
        stat = (stat * inv_chw).astype(buf.dtype)

        # Stat channels broadcast over HW lanes and the G group members.
        # NOTE: if C*HW is not a multiple of 128 this is a (small) masked vst;
        # the passthrough span itself always starts lane-aligned at 0.
        stat_row = jnp.broadcast_to(stat, (F, HW)).reshape(1, FHW)      # (1, F*HW)
        buf[:, pl.ds(CHW, FHW)] = jnp.broadcast_to(stat_row, (G, FHW))

        # Write the whole (G, (C+F)*HW) column back to HBM.
        cp_out = pltpu.make_async_copy(
            buf,
            o_hbm.at[:, pl.ds(out_start, OHW)],
            sem_out,
        )
        cp_out.start()
        cp_out.wait()

    return kernel


def _vmem_budget_bytes():
    """Physical VMEM per core minus headroom for compiler-internal scratch."""
    try:
        cap = int(pltpu.get_tpu_info().vmem_capacity_bytes)
    except Exception:
        cap = 64 * 1024 * 1024          # conservative: v7x per-TensorCore VMEM
    return cap - max(cap // 8, 8 * 1024 * 1024)   # 64 -> 56 MiB, 128 -> 112 MiB


def minibatch_std(x, group_size, num_channels=1):
    """Pallas implementation of MinibatchStdLayer.forward (NCHW input)."""
    N, C, H, W = x.shape
    G = min(group_size, N) if group_size is not None else N
    F = num_channels
    assert C % F == 0, "C must be divisible by num_channels"
    assert N % G == 0, "N must be divisible by the (clamped) group size"
    c = C // F
    M = N // G
    HW = H * W
    CHW = C * HW
    OHW = (C + F) * HW

    # Free contiguous reshape: split batch into (G, M) (matching the PyTorch
    # x.reshape(G, -1, ...) grouping) and flatten (M, C, H, W) into one
    # lane-dense axis so the kernel only needs dynamic slices on the last dim.
    x2 = x.reshape(G, M * CHW)

    kernel = _make_mbstd_kernel(G, C, HW, F, c)

    # --- VMEM budget (generation aware) -------------------------------------
    dsize = jnp.dtype(x.dtype).itemsize
    g_pad = -(-G // 8) * 8
    lane_pad = lambda n: -(-n // 128) * 128
    buf_bytes = g_pad * lane_pad(OHW) * dsize          # single staging buffer
    f32_slab = g_pad * lane_pad(CHW) * 4               # (G, C*HW) f32 temp
    vmem_need = buf_bytes + 3 * f32_slab + (2 << 20)   # y, d, squares + margin
    vmem_cap = _vmem_budget_bytes()
    if vmem_need > vmem_cap:
        # TODO(synk): chunked c*HW tiling with per-F accumulators instead of
        # failing when one group column exceeds the per-core VMEM budget.
        raise NotImplementedError(
            f"one group column needs ~{vmem_need >> 20} MiB VMEM, budget is "
            f"{vmem_cap >> 20} MiB; chunked tiling not implemented")
    vmem_limit = int(min(max(vmem_need, 32 * 1024 * 1024), vmem_cap))

    # Advisory cost: HBM-bound (read x once, write x plus F stat channels
    # once); one sqrt per (M, C, H, W) position.
    cost = pl.CostEstimate(
        flops=int(5 * N * CHW),
        transcendentals=int(M * CHW),
        bytes_accessed=int(N * CHW * dsize + N * OHW * dsize),
    )

    out = pl.pallas_call(
        kernel,
        out_shape=jax.ShapeDtypeStruct((G, M * OHW), x.dtype),
        grid=(M,),
        in_specs=[pl.BlockSpec(memory_space=pl.ANY)],
        out_specs=pl.BlockSpec(memory_space=pl.ANY),
        scratch_shapes=[
            pltpu.VMEM((G, OHW), x.dtype),
            pltpu.SemaphoreType.DMA(()),
            pltpu.SemaphoreType.DMA(()),
        ],
        compiler_params=pltpu.CompilerParams(
            dimension_semantics=("parallel",),
            vmem_limit_bytes=vmem_limit,
        ),
        cost_estimate=cost,
    )(x2)
    return out.reshape(N, C + F, H, W)


def minibatch_std_ref(x, group_size, num_channels=1):
    """Pure-JAX reference, line-for-line port of the PyTorch forward."""
    N, C, H, W = x.shape
    G = min(group_size, N) if group_size is not None else N
    F = num_channels
    c = C // F
    y = x.reshape(G, -1, F, c, H, W)
    y = y - y.mean(axis=0)
    y = jnp.mean(jnp.square(y), axis=0)
    y = jnp.sqrt(y + 1e-8)
    y = y.mean(axis=(2, 3, 4))
    y = y.reshape(-1, F, 1, 1)
    y = jnp.tile(y, (G, 1, H, W))
    return jnp.concatenate([x, y], axis=1)


if __name__ == "__main__":
    # MinibatchStdLayer has no learnable parameters; only config
    # (group_size, num_channels) is needed.
    key = jax.random.PRNGKey(0)
    N, C, H, W = 8, 4, 16, 16
    group_size = 4        # -> G = 4, M = 2 (two grid steps)
    num_channels = 2      # -> F = 2, c = 2

    x = jax.random.normal(key, (N, C, H, W), dtype=jnp.float32)

    out = minibatch_std(x, group_size, num_channels)
    out = jax.block_until_ready(out)

    ref = minibatch_std_ref(x, group_size, num_channels)

    assert out.shape == (N, C + num_channels, H, W), out.shape
    assert out.dtype == x.dtype
    assert jnp.allclose(out, ref, atol=1e-5, rtol=1e-5), (
        float(jnp.max(jnp.abs(out - ref)))
    )
    print("KERNEL_OK")
</pallas_src>

<mosaic_0001>
module attributes {stable_mosaic.version = 11 : i64} {
  func.func @kernel(%arg0: i32, %arg1: memref<4x2048xf32, #tpu.memory_space<any>>, %arg2: memref<4x3072xf32, #tpu.memory_space<any>>, %arg3: memref<4x1536xf32, #tpu.memory_space<vmem>>, %arg4: memref<!tpu.dma_semaphore, #tpu.memory_space<semaphore_mem>>, %arg5: memref<!tpu.dma_semaphore, #tpu.memory_space<semaphore_mem>>) attributes {dimension_semantics = [#tpu.dimension_semantics<parallel>], iteration_bounds = array<i64: 2>, scalar_prefetch = 0 : i64, scratch_operands = 3 : i64, tpu.core_type = #tpu.core_type<tc>, window_params = [{}, {}]} {
    %c1024_i32 = arith.constant 1024 : i32
    %0 = arith.muli %arg0, %c1024_i32 : i32
    %c1536_i32 = arith.constant 1536 : i32
    %1 = arith.muli %arg0, %c1536_i32 : i32
    %2 = tpu.assume_multiple %0, 128 : i32
    %3 = tpu.assume_multiple %1, 128 : i32
    %c0_i32 = arith.constant 0 : i32
    %4 = tpu.memref_slice %arg1[%c0_i32, %2] : memref<4x2048xf32, #tpu.memory_space<any>> -> memref<4x1024xf32, #tpu.memory_space<any>>
    %c0_i32_0 = arith.constant 0 : i32
    %c0_i32_1 = arith.constant 0 : i32
    %5 = tpu.memref_slice %arg3[%c0_i32_0, %c0_i32_1] : memref<4x1536xf32, #tpu.memory_space<vmem>> -> memref<4x1024xf32, #tpu.memory_space<vmem>>
    tpu.enqueue_dma source(%4 : memref<4x1024xf32, #tpu.memory_space<any>>) target(%5 : memref<4x1024xf32, #tpu.memory_space<vmem>>) target_semaphore(%arg4 : memref<!tpu.dma_semaphore, #tpu.memory_space<semaphore_mem>>)
    %c0_i32_2 = arith.constant 0 : i32
    %6 = tpu.memref_slice %arg1[%c0_i32_2, %2] : memref<4x2048xf32, #tpu.memory_space<any>> -> memref<4x1024xf32, #tpu.memory_space<any>>
    %c0_i32_3 = arith.constant 0 : i32
    %c0_i32_4 = arith.constant 0 : i32
    %7 = tpu.memref_slice %arg3[%c0_i32_3, %c0_i32_4] : memref<4x1536xf32, #tpu.memory_space<vmem>> -> memref<4x1024xf32, #tpu.memory_space<vmem>>
    tpu.wait_dma2 semaphore(%arg4 : memref<!tpu.dma_semaphore, #tpu.memory_space<semaphore_mem>>) src(%6 : memref<4x1024xf32, #tpu.memory_space<any>>) dst(%7 : memref<4x1024xf32, #tpu.memory_space<vmem>>)
    %c0 = arith.constant 0 : index
    %c0_5 = arith.constant 0 : index
    %8 = vector.load %arg3[%c0, %c0_5] : memref<4x1536xf32, #tpu.memory_space<vmem>>, vector<4x1024xf32>
    %cst = arith.constant dense<0.000000e+00> : vector<1024xf32>
    %9 = vector.multi_reduction <add>, %8, %cst [0] : vector<4x1024xf32> to vector<1024xf32>
    %10 = vector.shape_cast %9 : vector<1024xf32> to vector<1x1024xf32>
    %cst_6 = arith.constant 2.500000e-01 : f32
    %11 = vector.broadcast %cst_6 : f32 to vector<1x1024xf32>
    %12 = arith.mulf %10, %11 : vector<1x1024xf32>
    %13 = vector.broadcast %12 : vector<1x1024xf32> to vector<4x1024xf32>
    %14 = arith.subf %8, %13 : vector<4x1024xf32>
    %15 = arith.mulf %14, %14 : vector<4x1024xf32>
    %cst_7 = arith.constant dense<0.000000e+00> : vector<1024xf32>
    %16 = vector.multi_reduction <add>, %15, %cst_7 [0] : vector<4x1024xf32> to vector<1024xf32>
    %17 = vector.shape_cast %16 : vector<1024xf32> to vector<1x1024xf32>
    %cst_8 = arith.constant 2.500000e-01 : f32
    %18 = vector.broadcast %cst_8 : f32 to vector<1x1024xf32>
    %19 = arith.mulf %17, %18 : vector<1x1024xf32>
    %cst_9 = arith.constant 9.99999993E-9 : f32
    %20 = vector.broadcast %cst_9 : f32 to vector<1x1024xf32>
    %21 = arith.addf %19, %20 : vector<1x1024xf32>
    %22 = math.sqrt %21 : vector<1x1024xf32>
    %23 = vector.shape_cast %22 : vector<1x1024xf32> to vector<2x512xf32>
    %cst_10 = arith.constant dense<0.000000e+00> : vector<2xf32>
    %24 = vector.multi_reduction <add>, %23, %cst_10 [1] : vector<2x512xf32> to vector<2xf32>
    %25 = vector.shape_cast %24 : vector<2xf32> to vector<2x1xf32>
    %cst_11 = arith.constant 0.001953125 : f32
    %26 = vector.broadcast %cst_11 : f32 to vector<2x1xf32>
    %27 = arith.mulf %25, %26 : vector<2x1xf32>
    %28 = vector.shape_cast %27 : vector<2x1xf32> to vector<2x1xf32>
    %29 = vector.broadcast %28 : vector<2x1xf32> to vector<2x256xf32>
    %30 = vector.shape_cast %29 : vector<2x256xf32> to vector<1x512xf32>
    %31 = vector.shape_cast %30 : vector<1x512xf32> to vector<1x512xf32>
    %32 = vector.broadcast %31 : vector<1x512xf32> to vector<4x512xf32>
    %c0_12 = arith.constant 0 : index
    %c1024 = arith.constant 1024 : index
    %33 = vector.load %arg3[%c0_12, %c1024] : memref<4x1536xf32, #tpu.memory_space<vmem>>, vector<4x512xf32>
    tpu.vector_store %arg3[%c0_12, %c1024], %32 {strides = array<i32>} : memref<4x1536xf32, #tpu.memory_space<vmem>>, vector<4x512xf32>,
    %c0_i32_13 = arith.constant 0 : i32
    %34 = tpu.memref_slice %arg2[%c0_i32_13, %3] : memref<4x3072xf32, #tpu.memory_space<any>> -> memref<4x1536xf32, #tpu.memory_space<any>>
    tpu.enqueue_dma source(%arg3 : memref<4x1536xf32, #tpu.memory_space<vmem>>) target(%34 : memref<4x1536xf32, #tpu.memory_space<any>>) target_semaphore(%arg5 : memref<!tpu.dma_semaphore, #tpu.memory_space<semaphore_mem>>)
    %c0_i32_14 = arith.constant 0 : i32
    %35 = tpu.memref_slice %arg2[%c0_i32_14, %3] : memref<4x3072xf32, #tpu.memory_space<any>> -> memref<4x1536xf32, #tpu.memory_space<any>>
    tpu.wait_dma2 semaphore(%arg5 : memref<!tpu.dma_semaphore, #tpu.memory_space<semaphore_mem>>) src(%arg3 : memref<4x1536xf32, #tpu.memory_space<vmem>>) dst(%35 : memref<4x1536xf32, #tpu.memory_space<any>>)
    return
  }
}

</mosaic_0001>

<bundles_post_ra>
// kernel: tpu_custom_call.1
= control target key start
LH: loop header
LB: loop body
LE: loop exit
PB: predicated region body
PF: predicated region fallthrough
CT: control target
= control target key end

     0   :  { %s592_s6 = smov 0   ;;  %s773_s0 = inlined_call_operand.hbm [shape: f32[4,2048], index: 0, kind: input, shape index: {}]   ;;  %s774_s1 = inlined_call_operand.hbm [shape: f32[4,3072], index: 1, kind: output, shape index: {}]  }
   0x1 LB: > { %s577_s7 = smov [#allocation2]   ;;  %s479_s9 = sshll.u32 %s575_s6, 10  ;;  %s575_s6 = sphi %s592_s6, %s11_s6  }
   0x2   : > { %s26_s8 = sshll.u32 %s577_s7, 4  ;;  %s14_s10 = smul.u32 1536, %s575_s6  ;;  %s599_s8 = int_to_ptr.vmem [resolvable:$true] %s26_s8 }
   0x3   : > { %s15_s11 = sshra.s32 %s479_s9, 7  ;;  %s519_s19 = scalar_lea.hbm %s773_s0, 1024 }
   0x4   : > { %s480_s12 = sshll.u32 %s15_s11, 6 }
   0x5   : > { %s18_s15 = scalar_lea.hbm %s773_s0, %s480_s12 }
   0x6   : > { %s517_s16 = scalar_lea.hbm %s18_s15, 512  ;;  %p520_p1 = scmp.lt.u32.totalorder %s18_s15, %s773_s0 }
   0x7   : > { %p518_p0 = scmp.ne.s32.totalorder %s18_s15, %s517_s16  ;;  %p521_p2 = scmp.lt.u32.totalorder %s519_s19, %s517_s16 }
   0x8   : > { %p523_p4 = scmp.lt.u32.totalorder %s517_s16, %s18_s15 }
   0x9   : > { %p522_p3 = por %p521_p2, %p520_p1 }
   0xb   : > { %p524_p5 = por %p523_p4, %p522_p3 }
   0xd   : > { %p525_p6 = pnand %p524_p5, %p518_p0 }
   0xf   : > { %528 = shalt.err (!%p525_p6)  }
  0x10   : > { %s529_s22 = scalar_lea.vmem %s599_s8, 512  ;;  %s613_s23 = scalar_lea.vmem %s599_s8, 768 }
  0x11   : > { %p530_p7 = scmp.ne.s32.totalorder %s599_s8, %s529_s22  ;;  %p534_p8 = scmp.lt.s32.totalorder %s599_s8, %s599_s8 }
  0x12   : > { %p535_p9 = scmp.lt.s32.totalorder %s613_s23, %s529_s22 }
  0x14   : > { %p536_p10 = por %p535_p9, %p534_p8 }
  0x16   : > { %p537_p11 = pnand %p536_p10, %p530_p7 }
  0x18   : > { %540 = shalt.err (!%p537_p11)  }
  0x19   : > { %29 = dma.hbm_to_vmem [thread:$0]  %s18_s15, 512, %s599_s8, [#allocation3] }
  0x1a   : > { %569 = dma.done.wait [#allocation3], 512 }
  0x1b   : > { %570 = vsyncadd [#allocation3], 4294966784  ;;  %vm50_vm0 = vcmask 1043456   ;;  %v622_v0 = vld [vmem:[#allocation2] sm:$0xff]  ;;  %v624_v1 = vld [vmem:[#allocation2 + $0x8] sm:$0xff]  ;;  %s440_s24 = sshra.s32 %s14_s10, 7  ;;  %p542_p12 = scmp.ne.s32.totalorder %s599_s8, %s613_s23 }
  0x1c   : > { %v626_v2 = vld [vmem:[#allocation2 + $0x10] sm:$0xff]  ;;  %v628_v3 = vld [vmem:[#allocation2 + $0x18] sm:$0xff]  ;;  %v42_v4 = vcombine.high %v622_v0, %v622_v0  ;;  %v43_v5 = vcombine.high %v624_v1, %v624_v1  ;;  %v51_v7 = vsel %vm50_vm0, %v622_v0, 0.0  ;;  %v65_v10 = vsel %vm50_vm0, %v624_v1, 0.0  ;;  %s481_s25 = sshll.u32 %s440_s24, 6  ;;  %p547_p13 = scmp.lt.s32.totalorder %s613_s23, %s613_s23 }
  0x1d   : > { %v44_v6 = vcombine.high %v626_v2, %v626_v2  ;;  %v45_v8 = vcombine.high %v628_v3, %v628_v3  ;;  %v52_v9 = vrot.slane %v51_v7, 4  ;;  %v79_v11 = vsel %vm50_vm0, %v626_v2, 0.0  ;;  %s443_s28 = scalar_lea.hbm %s774_s1, %s481_s25 }
  0x1e   : > { %v58_v12 = vsel %vm50_vm0, %v42_v4, 0.0  ;;  %v66_v13 = vrot.slane %v65_v10, 4  ;;  %v72_v14 = vsel %vm50_vm0, %v43_v5, 0.0  ;;  %v80_v15 = vrot.slane %v79_v11, 4  ;;  %p548_p0 = por %p547_p13, %p534_p8 }
  0x1f   : > { %v53_v16 = vadd.f32 %v52_v9, %v51_v7  ;;  %v59_v17 = vrot.slane %v58_v12, 4  ;;  %v73_v18 = vrot.slane %v72_v14, 4  ;;  %v86_v19 = vsel %vm50_vm0, %v44_v6, 0.0 }
  0x20   : > { %v67_v20 = vadd.f32 %v66_v13, %v65_v10  ;;  %v81_v21 = vadd.f32 %v80_v15, %v79_v11  ;;  %v87_v22 = vrot.slane %v86_v19, 4  ;;  %v93_v23 = vsel %vm50_vm0, %v628_v3, 0.0  ;;  %p549_p1 = pnand %p548_p0, %p542_p12 }
  0x21   : > { %v54_v24 = vrot.slane %v53_v16, 2  ;;  %v60_v25 = vadd.f32 %v59_v17, %v58_v12  ;;  %v74_v26 = vadd.f32 %v73_v18, %v72_v14  ;;  %v94_v27 = vrot.slane %v93_v23, 4 }
  0x22   : > { %v68_v28 = vrot.slane %v67_v20, 2  ;;  %v82_v29 = vrot.slane %v81_v21, 2  ;;  %v88_v30 = vadd.f32 %v87_v22, %v86_v19  ;;  %v100_v31 = vsel %vm50_vm0, %v45_v8, 0.0 }
  0x23   : > { %v55_v32 = vadd.f32 %v54_v24, %v53_v16  ;;  %v61_v33 = vrot.slane %v60_v25, 2  ;;  %v75_v34 = vrot.slane %v74_v26, 2  ;;  %v95_v35 = vadd.f32 %v94_v27, %v93_v23 }
  0x24   : > { %v69_v36 = vadd.f32 %v68_v28, %v67_v20  ;;  %v83_v37 = vadd.f32 %v82_v29, %v81_v21  ;;  %v89_v38 = vrot.slane %v88_v30, 2  ;;  %v101_v39 = vrot.slane %v100_v31, 4 }
  0x25   : > { %v56_v40 = vrot.slane %v55_v32, 1  ;;  %v62_v41 = vadd.f32 %v61_v33, %v60_v25  ;;  %v76_v42 = vadd.f32 %v75_v34, %v74_v26  ;;  %v96_v43 = vrot.slane %v95_v35, 2 }
  0x26   : > { %v70_v44 = vrot.slane %v69_v36, 1  ;;  %v84_v45 = vrot.slane %v83_v37, 1  ;;  %v90_v46 = vadd.f32 %v89_v38, %v88_v30  ;;  %v102_v47 = vadd.f32 %v101_v39, %v100_v31 }
  0x27   : > { %v57_v48 = vadd.f32 %v56_v40, %v55_v32  ;;  %v63_v49 = vrot.slane %v62_v41, 1  ;;  %v77_v50 = vrot.slane %v76_v42, 1  ;;  %v97_v51 = vadd.f32 %v96_v43, %v95_v35 }
  0x28   : > { %v71_v52 = vadd.f32 %v70_v44, %v69_v36  ;;  %v85_v53 = vadd.f32 %v84_v45, %v83_v37  ;;  %v91_v54 = vrot.slane %v90_v46, 1  ;;  %v103_v55 = vrot.slane %v102_v47, 2 }
  0x29   : > { %v64_v56 = vadd.f32 %v63_v49, %v62_v41  ;;  %v78_v57 = vadd.f32 %v77_v50, %v76_v42  ;;  %v98_v58 = vrot.slane %v97_v51, 1  ;;  %v107_v59 = vmul.f32 0.25, %v57_v48 }
  0x2a   : > { %v92_v60 = vadd.f32 %v91_v54, %v90_v46  ;;  %v104_v61 = vadd.f32 %v103_v55, %v102_v47  ;;  %v109_v62 = vmul.f32 0.25, %v71_v52  ;;  %v111_v63 = vmul.f32 0.25, %v85_v53 }
  0x2b   : > { %v99_v4 = vadd.f32 %v98_v58, %v97_v51  ;;  %v108_v5 = vmul.f32 0.25, %v64_v56  ;;  %v110_v6 = vmul.f32 0.25, %v78_v57 }
  0x2c   : > { %v105_v7 = vrot.slane %v104_v61, 1  ;;  %v112_v8 = vmul.f32 0.25, %v92_v60 }
  0x2d   : > { %v123_v9 = vcombine.low %v107_v59, %v108_v5  ;;  %v124_v10 = vcombine.low %v109_v62, %v110_v6  ;;  %v113_v12 = vmul.f32 0.25, %v99_v4 }
  0x2e   : > { %v106_v11 = vadd.f32 %v105_v7, %v104_v61  ;;  %v125_v13 = vcombine.low %v111_v63, %v112_v8 }
  0x2f   : > { %v131_v14 = vsub.f32 %v622_v0, %v123_v9  ;;  %v132_v15 = vsub.f32 %v624_v1, %v124_v10 }
  0x30   : > { %v114_v16 = vmul.f32 0.25, %v106_v11  ;;  %v133_v17 = vsub.f32 %v626_v2, %v125_v13 }
  0x31   : > { %v135_v18 = vmul.f32 %v131_v14, %v131_v14  ;;  %v136_v19 = vmul.f32 %v132_v15, %v132_v15 }
  0x32   : > { %v126_v20 = vcombine.low %v113_v12, %v114_v16  ;;  %v137_v21 = vmul.f32 %v133_v17, %v133_v17 }
  0x33   : > { %v143_v22 = vcombine.high %v135_v18, %v135_v18  ;;  %v144_v23 = vcombine.high %v136_v19, %v136_v19  ;;  %v151_v24 = vsel %vm50_vm0, %v135_v18, 0.0  ;;  %v165_v25 = vsel %vm50_vm0, %v136_v19, 0.0 }
  0x34   : > { %v134_v26 = vsub.f32 %v628_v3, %v126_v20  ;;  %v145_v27 = vcombine.high %v137_v21, %v137_v21  ;;  %v152_v28 = vrot.slane %v151_v24, 4  ;;  %v166_v0 = vrot.slane %v165_v25, 4 }
  0x35   : > { %v158_v1 = vsel %vm50_vm0, %v143_v22, 0.0  ;;  %v172_v29 = vsel %vm50_vm0, %v144_v23, 0.0  ;;  %v179_v2 = vsel %vm50_vm0, %v137_v21, 0.0 }
  0x36   : > { %v138_v30 = vmul.f32 %v134_v26, %v134_v26  ;;  %v153_v31 = vadd.f32 %v152_v28, %v151_v24  ;;  %v159_v32 = vrot.slane %v158_v1, 4  ;;  %v167_v33 = vadd.f32 %v166_v0, %v165_v25 }
  0x37   : > { %v173_v34 = vrot.slane %v172_v29, 4  ;;  %v180_v35 = vrot.slane %v179_v2, 4  ;;  %v186_v36 = vsel %vm50_vm0, %v145_v27, 0.0  ;;  %v294_v0 = vlaneseq }
  0x38   : > { %v146_v37 = vcombine.high %v138_v30, %v138_v30  ;;  %v154_v38 = vrot.slane %v153_v31, 2  ;;  %v160_v3 = vadd.f32 %v159_v32, %v158_v1  ;;  %v168_v39 = vrot.slane %v167_v33, 2 }
  0x39   : > { %v174_v40 = vadd.f32 %v173_v34, %v172_v29  ;;  %v181_v41 = vadd.f32 %v180_v35, %v179_v2  ;;  %v187_v42 = vrot.slane %v186_v36, 4  ;;  %v193_v43 = vsel %vm50_vm0, %v138_v30, 0.0 }
  0x3a   : > { %v155_v44 = vadd.f32 %v154_v38, %v153_v31  ;;  %v161_v45 = vrot.slane %v160_v3, 2  ;;  %v169_v46 = vadd.f32 %v168_v39, %v167_v33  ;;  %v194_v47 = vrot.slane %v193_v43, 4 }
  0x3b   : > { %v175_v48 = vrot.slane %v174_v40, 2  ;;  %v182_v49 = vrot.slane %v181_v41, 2  ;;  %v188_v50 = vadd.f32 %v187_v42, %v186_v36  ;;  %v200_v51 = vsel %vm50_vm0, %v146_v37, 0.0 }
  0x3c   : > { %v156_v52 = vrot.slane %v155_v44, 1  ;;  %v162_v53 = vadd.f32 %v161_v45, %v160_v3  ;;  %v170_v54 = vrot.slane %v169_v46, 1  ;;  %v195_v55 = vadd.f32 %v194_v47, %v193_v43 }
  0x3d   : > { %v176_v56 = vadd.f32 %v175_v48, %v174_v40  ;;  %v183_v57 = vadd.f32 %v182_v49, %v181_v41  ;;  %v189_v58 = vrot.slane %v188_v50, 2  ;;  %v201_v59 = vrot.slane %v200_v51, 4 }
  0x3e   : > { %v157_v60 = vadd.f32 %v156_v52, %v155_v44  ;;  %v163_v61 = vrot.slane %v162_v53, 1  ;;  %v171_v62 = vadd.f32 %v170_v54, %v169_v46  ;;  %v196_v63 = vrot.slane %v195_v55, 2 }
  0x3f   : > { %v177_v4 = vrot.slane %v176_v56, 1  ;;  %v184_v5 = vrot.slane %v183_v57, 1  ;;  %v190_v6 = vadd.f32 %v189_v58, %v188_v50  ;;  %v202_v7 = vadd.f32 %v201_v59, %v200_v51 }
  0x40   : > { %v164_v8 = vadd.f32 %v163_v61, %v162_v53  ;;  %v197_v9 = vadd.f32 %v196_v63, %v195_v55  ;;  %v207_v10 = vmul.f32 0.25, %v157_v60  ;;  %v209_v11 = vmul.f32 0.25, %v171_v62 }
  0x41   : > { %v178_v12 = vadd.f32 %v177_v4, %v176_v56  ;;  %v185_v13 = vadd.f32 %v184_v5, %v183_v57  ;;  %v191_v14 = vrot.slane %v190_v6, 1  ;;  %v203_v15 = vrot.slane %v202_v7, 2 }
  0x42   : > { %v198_v16 = vrot.slane %v197_v9, 1  ;;  %v208_v17 = vmul.f32 0.25, %v164_v8  ;;  %v215_v18 = vadd.f32 1e-08, %v207_v10  ;;  %v662_v25 = vadd.f32 1e-08, %v209_v11 }
  0x43   : > { %v192_v19 = vadd.f32 %v191_v14, %v190_v6  ;;  %v204_v20 = vadd.f32 %v203_v15, %v202_v7  ;;  %v210_v21 = vmul.f32 0.25, %v178_v12  ;;  %v211_v22 = vmul.f32 0.25, %v185_v13 }
  0x44   : > { %v199_v23 = vadd.f32 %v198_v16, %v197_v9  ;;  %v216_v24 = vadd.f32 1e-08, %v208_v17  ;;  %501 = vrsqrt.f32 %v215_v18  ;;  %v578_v2 = vmov 1966171168  }
  0x45   : > { %v205_v26 = vrot.slane %v204_v20, 1  ;;  %v212_v27 = vmul.f32 0.25, %v192_v19  ;;  %v664_v28 = vadd.f32 1e-08, %v210_v21  ;;  %v666_v29 = vadd.f32 1e-08, %v211_v22 }
  0x46   : > { %v213_v1 = vmul.f32 0.25, %v199_v23  ;;  %503 = vrsqrt.f32 %v216_v24  ;;  %v292_v30 = vunpack.c.l.s4 %v578_v2  ;;  %v675_v36 = vshrl.u32 %v294_v0, 7 }
  0x47   : > { %v206_v31 = vadd.f32 %v205_v26, %v204_v20  ;;  %v668_v32 = vadd.f32 1e-08, %v212_v27  ;;  %505 = vrsqrt.f32 %v662_v25  ;;  %vm225_vm1 = vcmp.eq.f32.partialorder %v215_v18, inf }
  0x48   : > { %v671_v34 = vadd.f32 1e-08, %v213_v1  ;;  %507 = vrsqrt.f32 %v664_v28  ;;  %v293_v35 = vunpack.c.0.s8 %v292_v30  ;;  %v228_v3 = vand.u32 2147483648, %v215_v18 }
  0x49   : > { %v214_v33 = vmul.f32 0.25, %v206_v31  ;;  %509 = vrsqrt.f32 %v666_v29  ;;  %vm227_vm2 = vcmp.eq.f32.partialorder %v215_v18, 0.0  ;;  %vm232_vm3 = vcmp.eq.f32.partialorder %v216_v24, inf }
  0x4a   : > { %511 = vrsqrt.f32 %v668_v32  ;;  %v683_v39 = vsub.s32 %v293_v35, %v675_v36  ;;  %vm234_vm4 = vcmp.eq.f32.partialorder %v216_v24, 0.0  ;;  %v235_v42 = vand.u32 2147483648, %v216_v24 }
  0x4b   : > { %v677_v37 = vadd.f32 1e-08, %v214_v33  ;;  %513 = vrsqrt.f32 %v671_v34  ;;  %vm239_vm5 = vcmp.eq.f32.partialorder %v662_v25, inf  ;;  %vm241_vm6 = vcmp.eq.f32.partialorder %v662_v25, 0.0 }
  0x4c   : > { %v242_v43 = vand.u32 2147483648, %v662_v25  ;;  %vm246_vm7 = vcmp.eq.f32.partialorder %v664_v28, inf  ;;  %vm248_vm8 = vcmp.eq.f32.partialorder %v664_v28, 0.0  ;;  %v249_v48 = vand.u32 2147483648, %v664_v28 }
  0x4d   : > { %515 = vrsqrt.f32 %v677_v37  ;;  %vm253_vm9 = vcmp.eq.f32.partialorder %v666_v29, inf  ;;  %vm255_vm10 = vcmp.eq.f32.partialorder %v666_v29, 0.0  ;;  %v256_v52 = vand.u32 2147483648, %v666_v29 }
  0x4e   : > { %v502_v38 = vpop.eup %501  ;;  %vm260_vm11 = vcmp.eq.f32.partialorder %v668_v32, inf  ;;  %vm262_vm12 = vcmp.eq.f32.partialorder %v668_v32, 0.0  ;;  %v263_v56 = vand.u32 2147483648, %v668_v32  ;;  %vm267_vm13 = vcmp.eq.f32.partialorder %v671_v34, inf }
  0x4f   : > { %v224_v40 = vmul.f32 %v502_v38, %v215_v18  ;;  %vm269_vm14 = vcmp.eq.f32.partialorder %v671_v34, 0.0  ;;  %v270_v63 = vand.u32 2147483648, %v671_v34  ;;  %vm274_vm15 = vcmp.eq.f32.partialorder %v677_v37, inf }
  0x50   : > { %v504_v41 = vpop.eup %503  ;;  %v277_v11 = vand.u32 2147483648, %v677_v37  ;;  %vm276_vm0 = vcmp.eq.f32.partialorder %v677_v37, 0.0  ;;  %v579_v22 = vmov 1935823168  }
  0x51   : > { %v226_v44 = vsel %vm225_vm1, %v215_v18, %v224_v40  ;;  %v231_v45 = vmul.f32 %v504_v41, %v216_v24  ;;  %v506_v46 = vpop.eup %505  ;;  %v338_v23 = vunpack.c.l.s4 %v579_v22  ;;  %vm366_vm1 = vcmask 1041408  }
  0x52   : > { %v229_v47 = vsel %vm227_vm2, %v228_v3, %v226_v44  ;;  %v508_v49 = vpop.eup %507  ;;  %v238_v51 = vmul.f32 %v506_v46, %v662_v25 }
  0x53   : > { %v233_v50 = vsel %vm232_vm3, %v216_v24, %v231_v45  ;;  %v510_v53 = vpop.eup %509  ;;  %v245_v55 = vmul.f32 %v508_v49, %v664_v28 }
  0x54   : > { %v236_v54 = vsel %vm234_vm4, %v235_v42, %v233_v50  ;;  %v240_v57 = vsel %vm239_vm5, %v662_v25, %v238_v51  ;;  %v252_v58 = vmul.f32 %v510_v53, %v666_v29  ;;  %v512_v60 = vpop.eup %511  ;;  %v581_v50 = vmov 839922192  }
  0x55   : > { %v287_v59 = vcombine.low %v229_v47, %v236_v54  ;;  %v243_v61 = vsel %vm241_vm6, %v242_v43, %v240_v57  ;;  %v247_v62 = vsel %vm246_vm7, %v664_v28, %v245_v55  ;;  %v514_v4 = vpop.eup %513  ;;  %v259_v7 = vmul.f32 %v512_v60, %v668_v32 }
  0x56   : > { %v250_v5 = vsel %vm248_vm8, %v249_v48, %v247_v62  ;;  %v254_v6 = vsel %vm253_vm9, %v666_v29, %v252_v58  ;;  %v266_v10 = vmul.f32 %v514_v4, %v671_v34  ;;  %v580_v28 = vmov 1983009808  }
  0x57   : > { %v516_v8 = vpop.eup %515  ;;  %v257_v9 = vsel %vm255_vm10, %v256_v52, %v254_v6  ;;  %v288_v12 = vcombine.low %v243_v61, %v250_v5  ;;  %v261_v13 = vsel %vm260_vm11, %v668_v32, %v259_v7  ;;  %v297_v15 = vrot.slane %v287_v59, %v683_v39 }
  0x58   : > { %v273_v14 = vmul.f32 %v516_v8, %v677_v37  ;;  %v264_v16 = vsel %vm262_vm12, %v263_v56, %v261_v13  ;;  %v268_v17 = vsel %vm267_vm13, %v671_v34, %v266_v10  ;;  %v347_v0 = vunpack.c.l.s4 %v580_v28 }
  0x59   : > { %v304_v18 = vrot.slane %v288_v12, %v683_v39  ;;  %v271_v19 = vsel %vm269_vm14, %v270_v63, %v268_v17  ;;  %v289_v21 = vcombine.low %v257_v9, %v264_v16  ;;  %v339_v29 = vunpack.c.0.s8 %v338_v23 }
  0x5a   : > { %v275_v20 = vsel %vm274_vm15, %v677_v37, %v273_v14  ;;  %v348_v31 = vunpack.c.0.s8 %v347_v0  ;;  %v379_v51 = vunpack.c.l.s4 %v581_v50  ;;  %v396_v56 = vsub.s32 0, %v675_v36 }
  0x5b   : > { %v278_v24 = vsel %vm276_vm0, %v277_v11, %v275_v20  ;;  %v311_v26 = vrot.slane %v289_v21, %v683_v39  ;;  %v319_v27 = vcombine.low %v297_v15, %v304_v18  ;;  %v342_v33 = vsub.s32 %v339_v29, %v675_v36 }
  0x5c   : > { %v290_v25 = vcombine.low %v271_v19, %v278_v24  ;;  %v351_v35 = vsub.s32 %v348_v31, %v675_v36  ;;  %v380_v52 = vunpack.c.0.s8 %v379_v51  ;;  %v400_v58 = vsub.s32 2, %v675_v36 }
  0x5d   : > { %v327_v30 = vrot.slane %v319_v27, %v683_v39  ;;  %v404_v59 = vsub.s32 4, %v675_v36  ;;  %v408_v60 = vsub.s32 6, %v675_v36 }
  0x5e   : > { %v318_v1 = vrot.slane %v290_v25, %v683_v39  ;;  %v383_v53 = vsub.s32 %v380_v52, %v675_v36 }
  0x60   : > { %v320_v2 = vcombine.low %v311_v26, %v318_v1 }
  0x62   : > { %v334_v32 = vrot.slane %v320_v2, %v683_v39 }
  0x64   : > { %v335_v34 = vcombine.low %v327_v30, %v334_v32 }
  0x66   : > { %v343_v37 = vrot.slane %v335_v34, %v342_v33 }
  0x68   : > { %v345_v38 = vcombine.high %v343_v37, %v343_v37  ;;  %v352_v3 = vrot.slane %v343_v37, %v351_v35 }
  0x6a   : > { %v359_v40 = vrot.slane %v345_v38, %v351_v35  ;;  %v360_v41 = vcombine.high %v352_v3, %v352_v3  ;;  %v367_v42 = vsel %vm366_vm1, %v352_v3, 0.0 }
  0x6c   : > { %v361_v43 = vcombine.high %v359_v40, %v359_v40  ;;  %v368_v44 = vsel %vm366_vm1, %v360_v41, 0.0  ;;  %v370_v45 = vsel %vm366_vm1, %v359_v40, 0.0 }
  0x6d   : > { %v369_v46 = vadd.f32 %v368_v44, %v367_v42 }
  0x6e   : > { %v372_v47 = vsel %vm366_vm1, %v361_v43, 0.0 }
  0x6f   : > { %v371_v48 = vadd.f32 %v370_v45, %v369_v46 }
  0x71   : > { %v373_v49 = vadd.f32 %v372_v47, %v371_v48 }
  0x73   : > { %374 = vadd.xlane.f32.xlu0 %v373_v49 }
 0x100   : > { %v375_v54 = vpop.xlane.xlu0 %374 }
 0x101   : > { %v376_v55 = vmul.f32 0.001953125, %v375_v54 }
 0x103   : > { %v384_v57 = vrot.slane %v376_v55, %v383_v53 }
 0x105   : > { %v392_v61 = vrot.slane %v384_v57, %v683_v39 }
 0x107   : > { %v397_v62 = vrot.slane %v392_v61, %v396_v56  ;;  %v401_v63 = vrot.slane %v392_v61, %v400_v58  ;;  %v405_v4 = vrot.slane %v392_v61, %v404_v59  ;;  %v409_v5 = vrot.slane %v392_v61, %v408_v60 }
 0x109   : > { %v417_v6 = vrot.slane %v397_v62, %v396_v56  ;;  %v421_v7 = vrot.slane %v401_v63, %v396_v56  ;;  %v425_v8 = vrot.slane %v405_v4, %v396_v56  ;;  %v429_v9 = vrot.slane %v409_v5, %v396_v56 }
 0x10b   : > { %v434_v10 = vcombine.low %v417_v6, %v421_v7  ;;  %v435_v36 = vcombine.low %v425_v8, %v429_v9 }
 0x10d   : > { %438 = vst [vmem:[#allocation2 + $0x20] sm:$0xff] %v434_v10  ;;  %439 = vst [vmem:[#allocation2 + $0x28] sm:$0xff] %v435_v36 }
 0x10e   : > { %552 = shalt.err (!%p549_p1)  }
 0x10f   : > { %s553_s29 = scalar_lea.hbm %s443_s28, 768  ;;  %s555_s3 = scalar_lea.hbm %s774_s1, 1536 }
 0x110   : > { %p554_p2 = scmp.ne.s32.totalorder %s443_s28, %s553_s29  ;;  %p556_p3 = scmp.lt.u32.totalorder %s443_s28, %s774_s1 }
 0x111   : > { %p557_p4 = scmp.lt.u32.totalorder %s555_s3, %s553_s29  ;;  %p559_p6 = scmp.lt.u32.totalorder %s553_s29, %s443_s28 }
 0x113   : > { %p558_p5 = por %p557_p4, %p556_p3 }
 0x115   : > { %p560_p7 = por %p559_p6, %p558_p5 }
 0x117   : > { %p561_p9 = pnand %p560_p7, %p554_p2 }
 0x119   : > { %564 = shalt.err (!%p561_p9)  }
 0x11a   : > { %454 = dma.vmem_to_hbm [thread:$0]  %s599_s8, 768, %s443_s28, [#allocation4] }
 0x11b   : > { %571 = dma.done.wait [#allocation4], 768 }
 0x11c   : > { %572 = vsyncadd [#allocation4], 4294966528  ;;  %s11_s6 = sadd.s32 1, %s575_s6  }
 0x11d   : > { %p8_p8 = scmp.ge.s32.totalorder %s11_s6, 2  }
 0x11f   :  { %10 = sbr.rel (!%p8_p8) target bundleno = 1 (0x1), region = 29 }
 0x126   :  { %458 = vsyncmov [#allocation3] }
 0x129   :  { %s459_s7 = vpop.sfrf %458 }
 0x12a   :  { %p482_p10 = scmp.ne.s32.totalorder %s459_s7, 0 }
 0x12c   :  { %463 = shalt.err (%p482_p10)  }
 0x12d   :  { %464 = vsyncmov [#allocation4] }
 0x130   :  { %s465_s9 = vpop.sfrf %464 }
 0x131   :  { %p483_p11 = scmp.ne.s32.totalorder %s465_s9, 0 }
 0x133   :  { %469 = shalt.err (%p483_p11)  }

</bundles_post_ra>
